<compile_context>
chip_gen: v7x
topology: tpu7x:2x2x1
jax: 0.10.0
libtpu: 0.0.40
codegen_flags: <defaults>
</compile_context>

<pallas_src>
from functools import partial

import jax
import jax.numpy as jnp
import numpy as np
from jax.experimental import pallas as pl
from jax.experimental.pallas import tpu as pltpu


def mom_kernel(w_ref, b_ref, x_ref, o_ref, *, gamma, n_layers):
    """Whole momentum recursion for one batch tile.

    w_ref : (L, D, D) bf16 VMEM -- all layer weights, resident
    b_ref : (L, 1, D) f32  VMEM -- all layer biases, resident
    x_ref : (TB, D)   f32       -- batch tile of the network input
    o_ref : (TB, D)   f32       -- batch tile of the network output
    """
    x = x_ref[...].astype(jnp.float32)   # momentum state kept in f32
    v = jnp.zeros_like(x)

    # L is small and static -> unroll at trace time (no grid-step overhead,
    # no carried-scratch plumbing; weights are indexed with static l).
    for l in range(n_layers):
        # f_l(x) = tanh(x @ W_l + b_l): bf16 operands on the MXU, f32 accum,
        # bias add on the VPU, tanh on the EUP (rides in free slots).
        f = jnp.tanh(
            jnp.dot(
                x.astype(w_ref.dtype), w_ref[l],
                preferred_element_type=jnp.float32,
            )
            + b_ref[l]
        )
        # momentum update: v <- gamma*v + (1-gamma)*f ;  x <- x + v
        v = gamma * v + (1.0 - gamma) * f
        x = x + v

    o_ref[...] = x.astype(o_ref.dtype)


def momentum_net_forward(x, weights, biases, gamma, *, batch_tile=None):
    """x: (B, D) f32; weights: (L, D, D) (bf16 recommended); biases: (L, D)."""
    B, D = x.shape
    L = weights.shape[0]
    assert weights.shape == (L, D, D)
    assert biases.shape == (L, D)

    if batch_tile is None:
        # One tile per call at small B; tile at 256 rows when B scales up so
        # the batch axis can shard across TensorCores (v7x) and stay in VMEM.
        batch_tile = B if B <= 256 else 256
    assert B % batch_tile == 0

    biases3 = biases.reshape(L, 1, D).astype(jnp.float32)
    kernel = partial(mom_kernel, gamma=float(gamma), n_layers=L)

    return pl.pallas_call(
        kernel,
        out_shape=jax.ShapeDtypeStruct((B, D), x.dtype),
        grid_spec=pltpu.PrefetchScalarGridSpec(
            num_scalar_prefetch=0,
            grid=(B // batch_tile,),                       # independent batch tiles
            in_specs=[
                pl.BlockSpec((L, D, D), lambda i: (0, 0, 0)),      # all weights
                pl.BlockSpec((L, 1, D), lambda i: (0, 0, 0)),      # all biases
                pl.BlockSpec((batch_tile, D), lambda i: (i, 0)),   # x tile
            ],
            out_specs=pl.BlockSpec((batch_tile, D), lambda i: (i, 0)),
        ),
        compiler_params=pltpu.CompilerParams(
            dimension_semantics=("parallel",),  # batch tiles are independent
        ),
    )(weights, biases3, x)


def momentum_net_reference(x, weights, biases, gamma):
    """Pure-JAX reference mirroring Mom.forward with init_speed=0
    (same bf16-operand / f32-accumulate matmul as the kernel)."""
    v = jnp.zeros_like(x)
    for l in range(weights.shape[0]):
        f = jnp.tanh(
            jnp.dot(x.astype(weights.dtype), weights[l],
                    preferred_element_type=jnp.float32)
            + biases[l]
        )
        v = gamma * v + (1.0 - gamma) * f
        x = x + v
    return x


if __name__ == "__main__":
    # Small but lane-dense shapes: batch=8 (one f32 sublane group),
    # hidden=128 (one full lane width), 4 residual layers.
    B, D, L = 8, 128, 4
    gamma = 0.9

    key = jax.random.PRNGKey(0)
    kx, kw, kb = jax.random.split(key, 3)

    # Deterministic parameter init (PyTorch Linear-style uniform +/- 1/sqrt(D)).
    bound = 1.0 / np.sqrt(D)
    x = jax.random.normal(kx, (B, D), dtype=jnp.float32)
    weights = jax.random.uniform(kw, (L, D, D), jnp.float32, -bound, bound)
    biases = jax.random.uniform(kb, (L, D), jnp.float32, -bound, bound)
    weights = weights.astype(jnp.bfloat16)   # matmul operands in bf16

    out = momentum_net_forward(x, weights, biases, gamma)
    out = jax.block_until_ready(out)

    ref = momentum_net_reference(x, weights, biases, gamma)
    np.testing.assert_allclose(np.asarray(out), np.asarray(ref),
                               rtol=2e-3, atol=2e-3)

    # TODO(synk): only the forward (MomentumMemory.forward, init_speed=0) is
    # implemented; the custom backward / TorchExactRep memory trick and
    # Mom.inverse have no forward-kernel equivalent here.
    print("KERNEL_OK")
</pallas_src>

<mosaic_0001>
module attributes {stable_mosaic.version = 11 : i64} {
  func.func @mom_kernel(%arg0: i32, %arg1: memref<4x128x128xbf16, #tpu.memory_space<vmem>>, %arg2: memref<4x1x128xf32, #tpu.memory_space<vmem>>, %arg3: memref<8x128xf32, #tpu.memory_space<vmem>>, %arg4: memref<8x128xf32, #tpu.memory_space<vmem>>) attributes {dimension_semantics = [#tpu.dimension_semantics<parallel>], iteration_bounds = array<i64: 1>, scalar_prefetch = 0 : i64, scratch_operands = 0 : i64, tpu.core_type = #tpu.core_type<tc>, window_params = [{pipeline_mode = #tpu.pipeline_mode<synchronous>, transform_indices = @transform_0, window_bounds = array<i64: 4, 128, 128>}, {pipeline_mode = #tpu.pipeline_mode<synchronous>, transform_indices = @transform_1, window_bounds = array<i64: 4, 1, 128>}, {transform_indices = @transform_2, window_bounds = array<i64: 8, 128>}, {transform_indices = @transform_3, window_bounds = array<i64: 8, 128>}]} {
    %c0 = arith.constant 0 : index
    %c0_0 = arith.constant 0 : index
    %0 = vector.load %arg3[%c0, %c0_0] : memref<8x128xf32, #tpu.memory_space<vmem>>, vector<8x128xf32>
    %cst = arith.constant 0.000000e+00 : f32
    %1 = vector.broadcast %cst : f32 to vector<8x128xf32>
    %2 = arith.truncf %0 : vector<8x128xf32> to vector<8x128xbf16>
    %c0_1 = arith.constant 0 : index
    %c0_2 = arith.constant 0 : index
    %c0_3 = arith.constant 0 : index
    %3 = vector.load %arg1[%c0_1, %c0_2, %c0_3] : memref<4x128x128xbf16, #tpu.memory_space<vmem>>, vector<1x128x128xbf16>
    %4 = vector.shape_cast %3 : vector<1x128x128xbf16> to vector<128x128xbf16>
    %cst_4 = arith.constant dense<0.000000e+00> : vector<8x128xf32>
    %5 = tpu.matmul %2, %4, %cst_4 {dimension_numbers = #tpu.dot_dimension_numbers<[1], [0], [0], [1], [0, 0, 1, 1], [], []>} : vector<8x128xbf16>, vector<128x128xbf16>, vector<8x128xf32> -> vector<8x128xf32>
    %c0_5 = arith.constant 0 : index
    %c0_6 = arith.constant 0 : index
    %c0_7 = arith.constant 0 : index
    %6 = vector.load %arg2[%c0_5, %c0_6, %c0_7] : memref<4x1x128xf32, #tpu.memory_space<vmem>>, vector<1x1x128xf32>
    %7 = vector.shape_cast %6 : vector<1x1x128xf32> to vector<1x128xf32>
    %8 = vector.broadcast %7 : vector<1x128xf32> to vector<8x128xf32>
    %9 = arith.addf %5, %8 : vector<8x128xf32>
    %10 = math.tanh %9 : vector<8x128xf32>
    %cst_8 = arith.constant 0.899999976 : f32
    %11 = vector.broadcast %cst_8 : f32 to vector<8x128xf32>
    %12 = arith.mulf %11, %1 : vector<8x128xf32>
    %cst_9 = arith.constant 1.000000e-01 : f32
    %13 = vector.broadcast %cst_9 : f32 to vector<8x128xf32>
    %14 = arith.mulf %13, %10 : vector<8x128xf32>
    %15 = arith.addf %12, %14 : vector<8x128xf32>
    %16 = arith.addf %0, %15 : vector<8x128xf32>
    %17 = arith.truncf %16 : vector<8x128xf32> to vector<8x128xbf16>
    %c1 = arith.constant 1 : index
    %c0_10 = arith.constant 0 : index
    %c0_11 = arith.constant 0 : index
    %18 = vector.load %arg1[%c1, %c0_10, %c0_11] : memref<4x128x128xbf16, #tpu.memory_space<vmem>>, vector<1x128x128xbf16>
    %19 = vector.shape_cast %18 : vector<1x128x128xbf16> to vector<128x128xbf16>
    %cst_12 = arith.constant dense<0.000000e+00> : vector<8x128xf32>
    %20 = tpu.matmul %17, %19, %cst_12 {dimension_numbers = #tpu.dot_dimension_numbers<[1], [0], [0], [1], [0, 0, 1, 1], [], []>} : vector<8x128xbf16>, vector<128x128xbf16>, vector<8x128xf32> -> vector<8x128xf32>
    %c1_13 = arith.constant 1 : index
    %c0_14 = arith.constant 0 : index
    %c0_15 = arith.constant 0 : index
    %21 = vector.load %arg2[%c1_13, %c0_14, %c0_15] : memref<4x1x128xf32, #tpu.memory_space<vmem>>, vector<1x1x128xf32>
    %22 = vector.shape_cast %21 : vector<1x1x128xf32> to vector<1x128xf32>
    %23 = vector.broadcast %22 : vector<1x128xf32> to vector<8x128xf32>
    %24 = arith.addf %20, %23 : vector<8x128xf32>
    %25 = math.tanh %24 : vector<8x128xf32>
    %cst_16 = arith.constant 0.899999976 : f32
    %26 = vector.broadcast %cst_16 : f32 to vector<8x128xf32>
    %27 = arith.mulf %26, %15 : vector<8x128xf32>
    %cst_17 = arith.constant 1.000000e-01 : f32
    %28 = vector.broadcast %cst_17 : f32 to vector<8x128xf32>
    %29 = arith.mulf %28, %25 : vector<8x128xf32>
    %30 = arith.addf %27, %29 : vector<8x128xf32>
    %31 = arith.addf %16, %30 : vector<8x128xf32>
    %32 = arith.truncf %31 : vector<8x128xf32> to vector<8x128xbf16>
    %c2 = arith.constant 2 : index
    %c0_18 = arith.constant 0 : index
    %c0_19 = arith.constant 0 : index
    %33 = vector.load %arg1[%c2, %c0_18, %c0_19] : memref<4x128x128xbf16, #tpu.memory_space<vmem>>, vector<1x128x128xbf16>
    %34 = vector.shape_cast %33 : vector<1x128x128xbf16> to vector<128x128xbf16>
    %cst_20 = arith.constant dense<0.000000e+00> : vector<8x128xf32>
    %35 = tpu.matmul %32, %34, %cst_20 {dimension_numbers = #tpu.dot_dimension_numbers<[1], [0], [0], [1], [0, 0, 1, 1], [], []>} : vector<8x128xbf16>, vector<128x128xbf16>, vector<8x128xf32> -> vector<8x128xf32>
    %c2_21 = arith.constant 2 : index
    %c0_22 = arith.constant 0 : index
    %c0_23 = arith.constant 0 : index
    %36 = vector.load %arg2[%c2_21, %c0_22, %c0_23] : memref<4x1x128xf32, #tpu.memory_space<vmem>>, vector<1x1x128xf32>
    %37 = vector.shape_cast %36 : vector<1x1x128xf32> to vector<1x128xf32>
    %38 = vector.broadcast %37 : vector<1x128xf32> to vector<8x128xf32>
    %39 = arith.addf %35, %38 : vector<8x128xf32>
    %40 = math.tanh %39 : vector<8x128xf32>
    %cst_24 = arith.constant 0.899999976 : f32
    %41 = vector.broadcast %cst_24 : f32 to vector<8x128xf32>
    %42 = arith.mulf %41, %30 : vector<8x128xf32>
    %cst_25 = arith.constant 1.000000e-01 : f32
    %43 = vector.broadcast %cst_25 : f32 to vector<8x128xf32>
    %44 = arith.mulf %43, %40 : vector<8x128xf32>
    %45 = arith.addf %42, %44 : vector<8x128xf32>
    %46 = arith.addf %31, %45 : vector<8x128xf32>
    %47 = arith.truncf %46 : vector<8x128xf32> to vector<8x128xbf16>
    %c3 = arith.constant 3 : index
    %c0_26 = arith.constant 0 : index
    %c0_27 = arith.constant 0 : index
    %48 = vector.load %arg1[%c3, %c0_26, %c0_27] : memref<4x128x128xbf16, #tpu.memory_space<vmem>>, vector<1x128x128xbf16>
    %49 = vector.shape_cast %48 : vector<1x128x128xbf16> to vector<128x128xbf16>
    %cst_28 = arith.constant dense<0.000000e+00> : vector<8x128xf32>
    %50 = tpu.matmul %47, %49, %cst_28 {dimension_numbers = #tpu.dot_dimension_numbers<[1], [0], [0], [1], [0, 0, 1, 1], [], []>} : vector<8x128xbf16>, vector<128x128xbf16>, vector<8x128xf32> -> vector<8x128xf32>
    %c3_29 = arith.constant 3 : index
    %c0_30 = arith.constant 0 : index
    %c0_31 = arith.constant 0 : index
    %51 = vector.load %arg2[%c3_29, %c0_30, %c0_31] : memref<4x1x128xf32, #tpu.memory_space<vmem>>, vector<1x1x128xf32>
    %52 = vector.shape_cast %51 : vector<1x1x128xf32> to vector<1x128xf32>
    %53 = vector.broadcast %52 : vector<1x128xf32> to vector<8x128xf32>
    %54 = arith.addf %50, %53 : vector<8x128xf32>
    %55 = math.tanh %54 : vector<8x128xf32>
    %cst_32 = arith.constant 0.899999976 : f32
    %56 = vector.broadcast %cst_32 : f32 to vector<8x128xf32>
    %57 = arith.mulf %56, %45 : vector<8x128xf32>
    %cst_33 = arith.constant 1.000000e-01 : f32
    %58 = vector.broadcast %cst_33 : f32 to vector<8x128xf32>
    %59 = arith.mulf %58, %55 : vector<8x128xf32>
    %60 = arith.addf %57, %59 : vector<8x128xf32>
    %61 = arith.addf %46, %60 : vector<8x128xf32>
    %c0_34 = arith.constant 0 : index
    %c0_35 = arith.constant 0 : index
    %62 = vector.load %arg4[%c0_34, %c0_35] : memref<8x128xf32, #tpu.memory_space<vmem>>, vector<8x128xf32>
    tpu.vector_store %arg4[%c0_34, %c0_35], %61 {strides = array<i32>} : memref<8x128xf32, #tpu.memory_space<vmem>>, vector<8x128xf32>,
    return
  }
  func.func @transform_0(%arg0: i32) -> (i32, i32, i32) {
    %c0_i32 = arith.constant 0 : i32
    %c0_i32_0 = arith.constant 0 : i32
    %c0_i32_1 = arith.constant 0 : i32
    %c0_i32_2 = arith.constant 0 : i32
    return %c0_i32, %c0_i32_0, %c0_i32_1 : i32, i32, i32
  }
  func.func @transform_1(%arg0: i32) -> (i32, i32, i32) {
    %c0_i32 = arith.constant 0 : i32
    %c0_i32_0 = arith.constant 0 : i32
    %c0_i32_1 = arith.constant 0 : i32
    %c0_i32_2 = arith.constant 0 : i32
    return %c0_i32, %c0_i32_0, %c0_i32_1 : i32, i32, i32
  }
  func.func @transform_2(%arg0: i32) -> (i32, i32) {
    %c0_i32 = arith.constant 0 : i32
    %c0_i32_0 = arith.constant 0 : i32
    return %arg0, %c0_i32 : i32, i32
  }
  func.func @transform_3(%arg0: i32) -> (i32, i32) {
    %c0_i32 = arith.constant 0 : i32
    %c0_i32_0 = arith.constant 0 : i32
    return %arg0, %c0_i32 : i32, i32
  }
}

</mosaic_0001>

<bundles_post_ra>
// kernel: tpu_custom_call.1
= control target key start
LH: loop header
LB: loop body
LE: loop exit
PB: predicated region body
PF: predicated region fallthrough
CT: control target
= control target key end

     0   :  { %8 = vsyncpa [#allocation3], 0  ;;  %s960_s0 = inlined_call_operand.hbm [shape: bf16[4,128,128], index: 0, kind: input, shape index: {}]   ;;  %s961_s1 = inlined_call_operand.hbm [shape: f32[4,1,128], index: 1, kind: input, shape index: {}]   ;;  %s962_s2 = inlined_call_operand.hbm [shape: f32[8,128], index: 2, kind: input, shape index: {}]   ;;  %s963_s3 = inlined_call_operand.hbm [shape: f32[8,128], index: 3, kind: output, shape index: {}]  }
   0x1   :  { %9 = vsyncpa [#allocation6], 0 }
   0x2   :  { %10 = vsyncpa [#allocation4], 0  ;;  %s842_s12 = smov [#allocation5]   ;;  %s748_s16 = scalar_lea.hbm %s961_s1, 64 }
   0x3   :  { %s28_s13 = sshll.u32 %s842_s12, 4  ;;  %p749_p0 = scmp.ne.s32.totalorder %s961_s1, %s748_s16  ;;  %s29_s13 = int_to_ptr.vmem [resolvable:$true] %s28_s13 }
   0x4   :  { %p752_p1 = scmp.lt.u32.totalorder %s748_s16, %s961_s1 }
   0x6   :  { %p754_p2 = pnand %p752_p1, %p749_p0 }
   0x8   :  { %757 = shalt.err (!%p754_p2)
}
   0x9   :  { %s758_s21 = scalar_lea.vmem %s29_s13, 64  ;;  %p763_p4 = scmp.lt.s32.totalorder %s29_s13, %s29_s13 }
   0xa   :  { %p759_p3 = scmp.ne.s32.totalorder %s29_s13, %s758_s21  ;;  %p764_p5 = scmp.lt.s32.totalorder %s758_s21, %s758_s21 }
   0xc   :  { %p765_p6 = por %p764_p5, %p763_p4 }
   0xe   :  { %p766_p7 = pnand %p765_p6, %p759_p3 }
  0x10   :  { %769 = shalt.err (!%p766_p7)
}
  0x11   :  { %s843_s22 = smov 16   ;;  %s844_s23 = smov 1  }
  0x12   :  { %34 = dma.hbm_to_vmem [thread:$0]  %s961_s1, 64, %s29_s13, [#allocation6], %s843_s22, %s843_s22, %s844_s23  }
  0x13   :  { %s845_s26 = smov [#allocation2]   ;;  %s770_s30 = scalar_lea.hbm %s960_s0, 4096 }
  0x14   :  { %s16_s27 = sshll.u32 %s845_s26, 4  ;;  %p771_p8 = scmp.ne.s32.totalorder %s960_s0, %s770_s30  ;;  %s17_s27 = int_to_ptr.vmem [resolvable:$true] %s16_s27 }
  0x15   :  { %p774_p9 = scmp.lt.u32.totalorder %s770_s30, %s960_s0 }
  0x17   :  { %p776_p10 = pnand %p774_p9, %p771_p8 }
  0x19   :  { %779 = shalt.err (!%p776_p10)
}
  0x1a   :  { %s780_s8 = scalar_lea.vmem %s17_s27, 4096  ;;  %p785_p12 = scmp.lt.s32.totalorder %s17_s27, %s17_s27 }
  0x1b   :  { %p781_p11 = scmp.ne.s32.totalorder %s17_s27, %s780_s8  ;;  %p786_p13 = scmp.lt.s32.totalorder %s780_s8, %s780_s8 }
  0x1d   :  { %p787_p0 = por %p786_p13, %p785_p12 }
  0x1f   :  { %p788_p1 = pnand %p787_p0, %p781_p11 }
  0x21   :  { %791 = shalt.err (!%p788_p1)
}
  0x22   :  { %s846_s1 = smov 64   ;;  %s847_s9 = smov 4  }
  0x23   :  { %22 = dma.hbm_to_vmem [thread:$0]  %s960_s0, 4096, %s17_s27, [#allocation3], %s846_s1, %s846_s1, %s847_s9  }
  0x24   :  { %s848_s12 = smov [#allocation7]   ;;  %s792_s16 = scalar_lea.hbm %s962_s2, 128 }
  0x25   :  { %s41_s13 = sshll.u32 %s848_s12, 4  ;;  %p793_p2 = scmp.ne.s32.totalorder %s962_s2, %s792_s16  ;;  %s42_s13 = int_to_ptr.vmem [resolvable:$true] %s41_s13 }
  0x26   :  { %p796_p3 = scmp.lt.u32.totalorder %s792_s16, %s962_s2 }
  0x28   :  { %p798_p4 = pnand %p796_p3, %p793_p2 }
  0x2a   :  { %801 = shalt.err (!%p798_p4)
}
  0x2b   :  { %s802_s21 = scalar_lea.vmem %s42_s13, 128  ;;  %p807_p6 = scmp.lt.s32.totalorder %s42_s13, %s42_s13 }
  0x2c   :  { %p803_p5 = scmp.ne.s32.totalorder %s42_s13, %s802_s21  ;;  %p808_p7 = scmp.lt.s32.totalorder %s802_s21, %s802_s21 }
  0x2e   :  { %p809_p8 = por %p808_p7, %p807_p6 }
  0x30   :  { %p810_p9 = pnand %p809_p8, %p803_p5 }
  0x32   :  { %813 = shalt.err (!%p810_p9)
}
  0x33   :  { %44 = dma.hbm_to_vmem [thread:$0]  %s962_s2, 128, %s42_s13, [#allocation6]  }
  0x34   :  { %836 = dma.done.wait [#allocation3], 4096  }
  0x35   :  { %837 = vsyncadd [#allocation3], 4294963200 }
  0x36   :  { %838 = dma.done.wait [#allocation6], 192  }
  0x37   :  { %839 = vsyncadd [#allocation6], 4294967104  ;;  %v849_v0 = vmov 0.0   ;;  %vm850_vm0 = vmmov 0   ;;  %v708_v1 = vld [vmem:[#allocation2] sm:$0xff]   ;;  %v709_v2 = vld [vmem:[#allocation2 + $0x8] sm:$0xff]  }
  0x38   :  { %618 = vmatprep.subr.bf16.mxu0 %v849_v0  ;;  %634 = vmatprep.mubr.msk.bf16.mxu0 %vm850_vm0, %v849_v0  ;;  %v710_v3 = vld [vmem:[#allocation2 + $0x10] sm:$0xff]   ;;  %v716_v4 = vld [vmem:[#allocation2 + $0x40] sm:$0xff]   ;;  %v711_v5 = vld [vmem:[#allocation2 + $0x18] sm:$0xff]   ;;  %s851_s2 = smov [#allocation8]  }
  0x39   :  { %638 = vmatprep.subr.bf16.mxu1 %v849_v0  ;;  %654 = vmatprep.mubr.msk.bf16.mxu1 %vm850_vm0, %v849_v0  ;;  %v717_v6 = vld [vmem:[#allocation2 + $0x48] sm:$0xff]   ;;  %v712_v7 = vld [vmem:[#allocation2 + $0x20] sm:$0xff]   ;;  %v718_v8 = vld [vmem:[#allocation2 + $0x50] sm:$0xff]   ;;  %s536_s23 = sshll.u32 %s851_s2, 4  ;;  %s537_s23 = int_to_ptr.vmem [resolvable:$true] %s536_s23 }
  0x3a   :  { %619 = vmatpush3.bf16.msra.mxu0 %v708_v1  ;;  %639 = vmatpush3.bf16.msra.mxu1 %v716_v4  ;;  %v713_v9 = vld [vmem:[#allocation2 + $0x28] sm:$0xff]   ;;  %v714_v10 = vld [vmem:[#allocation2 + $0x30] sm:$0xff]   ;;  %v715_v11 = vld [vmem:[#allocation2 + $0x38] sm:$0xff]   ;;  %s814_s24 = scalar_lea.vmem %s537_s23, 128  ;;  %p819_p11 = scmp.lt.s32.totalorder %s537_s23, %s537_s23 }
  0x3b   :  { %620 = vmatprep.subr.bf16.mxu0 %v849_v0  ;;  %640 = vmatprep.subr.bf16.mxu1 %v849_v0  ;;  %v55_v12 = vld [vmem:[#allocation7] sm:$0xff]  ;;  %v719_v14 = vld [vmem:[#allocation2 + $0x58] sm:$0xff]   ;;  %v722_v17 = vld [vmem:[#allocation2 + $0x70] sm:$0xff]   ;;  %p815_p10 = scmp.ne.s32.totalorder %s537_s23, %s814_s24  ;;  %p820_p12 = scmp.lt.s32.totalorder %s814_s24, %s814_s24 }
  0x3c   :  { %v56_v13 = vpack.c.bf16 %v55_v12, %v55_v12  ;;  %v720_v15 = vld [vmem:[#allocation2 + $0x60] sm:$0xff]   ;;  %v721_v16 = vld [vmem:[#allocation2 + $0x68] sm:$0xff]   ;;  %v723_v18 = vld [vmem:[#allocation2 + $0x78] sm:$0xff]  }
  0x3d   :  { %v724_v19 = vld [vmem:[#allocation2 + $0x80] sm:$0xff]   ;;  %v725_v20 = vld [vmem:[#allocation2 + $0x88] sm:$0xff]   ;;  %v726_v21 = vld [vmem:[#allocation2 + $0x90] sm:$0xff]   ;;  %p821_p13 = por %p820_p12, %p819_p11 }
  0x3e   :  { %621 = vmatpush3.bf16.msra.mxu0 %v709_v2  ;;  %641 = vmatpush3.bf16.msra.mxu1 %v717_v6  ;;  %v546_v22 = vld [vmem:[#allocation5] ss:$0 sm:$0xff]  ;;  %v727_v32 = vld [vmem:[#allocation2 + $0x98] sm:$0xff]   ;;  %v729_v34 = vld [vmem:[#allocation2 + $0xa8] sm:$0xff]  }
  0x3f   :  { %622 = vmatprep.subr.bf16.mxu0 %v849_v0  ;;  %642 = vmatprep.subr.bf16.mxu1 %v849_v0  ;;  %v728_v33 = vld [vmem:[#allocation2 + $0xa0] sm:$0xff]   ;;  %v730_v35 = vld [vmem:[#allocation2 + $0xb0] sm:$0xff]   ;;  %v731_v36 = vld [vmem:[#allocation2 + $0xb8] sm:$0xff]   ;;  %p822_p0 = pnand %p821_p13, %p815_p10 }
  0x40   :  { %v732_v37 = vld [vmem:[#allocation2 + $0xc0] sm:$0xff]   ;;  %v733_v38 = vld [vmem:[#allocation2 + $0xc8] sm:$0xff]   ;;  %v734_v39 = vld [vmem:[#allocation2 + $0xd0] sm:$0xff]  }
  0x41   :  { %v555_v40 = vld [vmem:[#allocation5 + $0x1] ss:$0 sm:$0xff]  ;;  %v735_v52 = vld [vmem:[#allocation2 + $0xd8] sm:$0xff]   ;;  %v737_v54 = vld [vmem:[#allocation2 + $0xe8] sm:$0xff]  }
  0x42   :  { %623 = vmatpush3.bf16.msra.mxu0 %v710_v3  ;;  %643 = vmatpush3.bf16.msra.mxu1 %v718_v8  ;;  %v736_v53 = vld [vmem:[#allocation2 + $0xe0] sm:$0xff]   ;;  %v738_v55 = vld [vmem:[#allocation2 + $0xf0] sm:$0xff]   ;;  %v739_v56 = vld [vmem:[#allocation2 + $0xf8] sm:$0xff]  }
  0x43   :  { %624 = vmatprep.subr.bf16.mxu0 %v849_v0  ;;  %644 = vmatprep.subr.bf16.mxu1 %v849_v0  ;;  %v564_v57 = vld [vmem:[#allocation5 + $0x2] ss:$0 sm:$0xff]  ;;  %v573_v6 = vld [vmem:[#allocation5 + $0x3] ss:$0 sm:$0xff] }
  0x46   :  { %625 = vmatpush3.bf16.msra.mxu0 %v711_v5  ;;  %645 = vmatpush3.bf16.msra.mxu1 %v719_v14 }
  0x47   :  { %626 = vmatprep.subr.bf16.mxu0 %v849_v0  ;;  %646 = vmatprep.subr.bf16.mxu1 %v849_v0 }
  0x4a   :  { %627 = vmatpush3.bf16.msra.mxu0 %v712_v7  ;;  %647 = vmatpush3.bf16.msra.mxu1 %v720_v15 }
  0x4b   :  { %628 = vmatprep.subr.bf16.mxu0 %v849_v0  ;;  %648 = vmatprep.subr.bf16.mxu1 %v849_v0 }
  0x4e   :  { %629 = vmatpush3.bf16.msra.mxu0 %v713_v9  ;;  %649 = vmatpush3.bf16.msra.mxu1 %v721_v16 }
  0x4f   :  { %630 = vmatprep.subr.bf16.mxu0 %v849_v0  ;;  %650 = vmatprep.subr.bf16.mxu1 %v849_v0 }
  0x52   :  { %631 = vmatpush3.bf16.msra.mxu0 %v714_v10  ;;  %651 = vmatpush3.bf16.msra.mxu1 %v722_v17 }
  0x53   :  { %632 = vmatprep.subr.bf16.mxu0 %v849_v0  ;;  %652 = vmatprep.subr.bf16.mxu1 %v849_v0 }
  0x56   :  { %633 = vmatpush3.bf16.msra.mxu0 %v715_v11  ;;  %653 = vmatpush3.bf16.msra.mxu1 %v723_v18 }
  0x57   :  { %658 = vmatprep.subr.bf16.mxu0 %v849_v0  ;;  %678 = vmatprep.subr.bf16.mxu1 %v849_v0 }
  0x59   :  { %635 = vmatmul.mubr.bf16.vlgmr.msra.gmra.mrb[0].mxu0 %v56_v13 }
  0x5a   :  { %674 = vmatprep.mubr.msk.bf16.mxu0 %vm850_vm0, %v849_v0  ;;  %659 = vmatpush3.bf16.msra.mxu0 %v724_v19 }
  0x5b   :  { %660 = vmatprep.subr.bf16.mxu0 %v849_v0 }
  0x5e   :  { %661 = vmatpush3.bf16.msra.mxu0 %v725_v20 }
  0x5f   :  { %662 = vmatprep.subr.bf16.mxu0 %v849_v0 }
  0x62   :  { %663 = vmatpush3.bf16.msra.mxu0 %v726_v21 }
  0x63   :  { %664 = vmatprep.subr.bf16.mxu0 %v849_v0 }
  0x66   :  { %665 = vmatpush3.bf16.msra.mxu0 %v727_v32 }
  0x67   :  { %666 = vmatprep.subr.bf16.mxu0 %v849_v0 }
  0x6a   :  { %667 = vmatpush3.bf16.msra.mxu0 %v728_v33 }
  0x6b   :  { %668 = vmatprep.subr.bf16.mxu0 %v849_v0 }
  0x6e   :  { %669 = vmatpush3.bf16.msra.mxu0 %v729_v34 }
  0x6f   :  { %670 = vmatprep.subr.bf16.mxu0 %v849_v0 }
  0x72   :  { %671 = vmatpush3.bf16.msra.mxu0 %v730_v35 }
  0x73   :  { %672 = vmatprep.subr.bf16.mxu0 %v849_v0 }
  0x76   :  { %673 = vmatpush3.bf16.msra.mxu0 %v731_v36 }
 0x12c   :  { %v162_v23 = vpop.f32.mrb[0].mxu0 }
 0x12d   :  { %v163_v24 = vadd.f32 %v546_v22, %v162_v23  ;;  %v636_v25 = vpop.f32.mrb[1].mxu0 }
 0x12e   :  { %v165_v26 = vpop.f32.mrb[2].mxu0 }
 0x12f   :  { %740 = vtanh.f32 %v163_v24  ;;  %v637_v27 = vpop.f32.mrb[3].mxu0 }
 0x139   :  { %v741_v28 = vpop.eup %740 }
 0x13a   :  { %v169_v29 = vmul.f32 0.1, %v741_v28 }
 0x13c   :  { %v171_v30 = vadd.f32 %v169_v29, %v55_v12  ;;  %v287_v47 = vmul.f32 0.9, %v169_v29 }
 0x13e   :  { %v172_v31 = vpack.c.bf16 %v171_v30, %v171_v30 }
 0x140   :  { %655 = vmatmul.mubr.bf16.vlgmr.msra.gmra.mrb[0].mxu1 %v172_v31 }
 0x141   :  { %694 = vmatprep.mubr.msk.bf16.mxu1 %vm850_vm0, %v849_v0  ;;  %679 = vmatpush3.bf16.msra.mxu1 %v732_v37 }
 0x142   :  { %680 = vmatprep.subr.bf16.mxu1 %v849_v0 }
 0x145   :  { %681 = vmatpush3.bf16.msra.mxu1 %v733_v38 }
 0x146   :  { %682 = vmatprep.subr.bf16.mxu1 %v849_v0 }
 0x149   :  { %683 = vmatpush3.bf16.msra.mxu1 %v734_v39 }
 0x14a   :  { %684 = vmatprep.subr.bf16.mxu1 %v849_v0 }
 0x14d   :  { %685 = vmatpush3.bf16.msra.mxu1 %v735_v52 }
 0x14e   :  { %686 = vmatprep.subr.bf16.mxu1 %v849_v0 }
 0x151   :  { %687 = vmatpush3.bf16.msra.mxu1 %v736_v53 }
 0x152   :  { %688 = vmatprep.subr.bf16.mxu1 %v849_v0 }
 0x155   :  { %689 = vmatpush3.bf16.msra.mxu1 %v737_v54 }
 0x156   :  { %690 = vmatprep.subr.bf16.mxu1 %v849_v0 }
 0x159   :  { %691 = vmatpush3.bf16.msra.mxu1 %v738_v55 }
 0x15a   :  { %692 = vmatprep.subr.bf16.mxu1 %v849_v0 }
 0x15d   :  { %693 = vmatpush3.bf16.msra.mxu1 %v739_v56 }
 0x213   :  { %v280_v41 = vpop.f32.mrb[0].mxu1 }
 0x214   :  { %v281_v42 = vadd.f32 %v555_v40, %v280_v41  ;;  %v656_v43 = vpop.f32.mrb[1].mxu1 }
 0x215   :  { %v283_v44 = vpop.f32.mrb[2].mxu1 }
 0x216   :  { %742 = vtanh.f32 %v281_v42  ;;  %v657_v45 = vpop.f32.mrb[3].mxu1 }
 0x220   :  { %v743_v46 = vpop.eup %742 }
 0x221   :  { %v288_v48 = vmul.f32 0.1, %v743_v46 }
 0x223   :  { %v289_v49 = vadd.f32 %v288_v48, %v287_v47 }
 0x225   :  { %v290_v50 = vadd.f32 %v289_v49, %v171_v30  ;;  %v406_v1 = vmul.f32 0.9, %v289_v49 }
 0x227   :  { %v291_v51 = vpack.c.bf16 %v290_v50, %v290_v50 }
 0x229   :  { %675 = vmatmul.mubr.bf16.vlgmr.msra.gmra.mrb[4].mxu0 %v291_v51 }
 0x2fc   :  { %v399_v58 = vpop.f32.mrb[4].mxu0 }
 0x2fd   :  { %v400_v59 = vadd.f32 %v564_v57, %v399_v58  ;;  %v676_v60 = vpop.f32.mrb[5].mxu0 }
 0x2fe   :  { %v402_v61 = vpop.f32.mrb[6].mxu0 }
 0x2ff   :  { %744 = vtanh.f32 %v400_v59  ;;  %v677_v62 = vpop.f32.mrb[7].mxu0 }
 0x309   :  { %v745_v63 = vpop.eup %744 }
 0x30a   :  { %v407_v2 = vmul.f32 0.1, %v745_v63 }
 0x30c   :  { %v408_v3 = vadd.f32 %v407_v2, %v406_v1 }
 0x30e   :  { %v409_v4 = vadd.f32 %v408_v3, %v290_v50  ;;  %v525_v13 = vmul.f32 0.9, %v408_v3 }
 0x310   :  { %v410_v5 = vpack.c.bf16 %v409_v4, %v409_v4 }
 0x312   :  { %695 = vmatmul.mubr.bf16.vlgmr.msra.gmra.mrb[4].mxu1 %v410_v5 }
 0x3e5   :  { %v518_v7 = vpop.f32.mrb[4].mxu1 }
 0x3e6   :  { %v519_v8 = vadd.f32 %v573_v6, %v518_v7  ;;  %v696_v0 = vpop.f32.mrb[5].mxu1 }
 0x3e7   :  { %v521_v9 = vpop.f32.mrb[6].mxu1 }
 0x3e8   :  { %746 = vtanh.f32 %v519_v8  ;;  %v697_v10 = vpop.f32.mrb[7].mxu1 }
 0x3f2   :  { %v747_v11 = vpop.eup %746 }
 0x3f3   :  { %v526_v12 = vmul.f32 0.1, %v747_v11 }
 0x3f5   :  { %v527_v14 = vadd.f32 %v526_v12, %v525_v13 }
 0x3f7   :  { %v528_v15 = vadd.f32 %v527_v14, %v409_v4 }
 0x3f9   :  { %529 = vst [vmem:[#allocation8] sm:$0xff] %v528_v15 }
 0x3fa   :  { %825 = shalt.err (!%p822_p0)
}
 0x3fb   :  { %s826_s27 = scalar_lea.hbm %s963_s3, 128 }
 0x3fc   :  { %p827_p1 = scmp.ne.s32.totalorder %s963_s3, %s826_s27  ;;  %p830_p2 = scmp.lt.u32.totalorder %s826_s27, %s963_s3 }
 0x3fe   :  { %p832_p3 = pnand %p830_p2, %p827_p1 }
 0x400   :  { %835 = shalt.err (!%p832_p3)
}
 0x401   :  { %539 = dma.vmem_to_hbm [thread:$0]  %s537_s23, 128, %s963_s3, [#allocation4]  }
 0x402   :  { %840 = dma.done.wait [#allocation4], 128  }
 0x403   :  { %841 = vsyncadd [#allocation4], 4294967168 }
 0x404   :  { %543 = vsyncpa [#allocation3], 1 }
 0x405   :  { %544 = vsyncpa [#allocation6], 1 }
 0x406   :  { %545 = vsyncpa [#allocation4], 1 }

</bundles_post_ra>
